<compile_context>
chip_gen: v6e
topology: v6e:2x2x1
jax: 0.10.0
libtpu: 0.0.40
codegen_flags: <defaults>
</compile_context>

<pallas_src>
import functools

import jax
import jax.numpy as jnp
from jax.experimental import pallas as pl
from jax.experimental.pallas import tpu as pltpu


def _mlp_kernel(x_ref, w1_ref, b1_ref, w2_ref, b2_ref, o_ref):
    # x_ref : (tm, D)   row tile of the flattened features (f32 or bf16)
    # w1_ref: (D, D)    fc1 weight in (in, out) layout (same dtype as x)
    # b1_ref: (1, D)    fc1 bias, f32
    # w2_ref: (1, D)    fc2 weight row, f32
    # b2_ref: (1,)      fc2 bias, SMEM scalar
    # o_ref : (1, tm)   lane-dense output row tile

    # fc1 on the MXU with an f32 accumulator.
    h = jnp.dot(x_ref[...], w1_ref[...], preferred_element_type=jnp.float32)
    # Bias + ReLU on the VPU in f32 (stays f32 even when matmul operands are
    # bf16 -> safe on v5e which has no bf16 VPU/EUP).
    h = jnp.maximum(h + b1_ref[...], 0.0)
    # Dropout is the identity in eval/inference mode.

    # fc2 (D -> 1): VPU multiply + cross-lane reduction on the XLU (separate
    # slot from the MXU/VPU, so it's overlapped work).
    y = jnp.sum(h * w2_ref[...], axis=-1) + b2_ref[0]            # (tm,)
    # Sublane -> lane relayout so the store is a dense, unmasked vst.
    o_ref[...] = y.reshape(1, -1).astype(o_ref.dtype)


@functools.partial(jax.jit, static_argnames=("tm", "use_bf16_matmul"))
def mlp_forward(features, w1, b1, w2, b2, *, tm=512, use_bf16_matmul=False):
    """features: [..., D_MODEL] -> output [..., 1] (same math as MLP.forward in eval)."""
    d_model = features.shape[-1]
    lead = features.shape[:-1]
    out_dtype = features.dtype

    assert tm % 128 == 0, "tm must be a multiple of 128 (lane-dense output tile)"

    x = features.reshape(-1, d_model)
    n = x.shape[0]

    # Clamp the row tile to the 128-aligned row count so small inputs use a
    # single small tile instead of padding all the way up to the default tm.
    n_pad128 = ((n + 127) // 128) * 128
    tm_eff = min(tm, n_pad128)

    n_pad = ((n + tm_eff - 1) // tm_eff) * tm_eff
    if n_pad != n:
        # Pad to a whole number of row tiles; padded rows compute garbage that
        # is sliced off below (no NaNs: relu(b1) @ w2 + b2 is finite).
        x = jnp.pad(x, ((0, n_pad - n), (0, 0)))
    n_tiles = n_pad // tm_eff

    # fc1 operands in (in, out) layout so the kernel does plain x @ W.
    compute_dtype = jnp.bfloat16 if use_bf16_matmul else jnp.float32
    x_in = x.astype(compute_dtype)
    w1_t = w1.T.astype(compute_dtype)                       # (D, D)
    b1_r = b1.reshape(1, d_model).astype(jnp.float32)       # (1, D)  f32 elementwise path
    w2_r = w2.reshape(1, d_model).astype(jnp.float32)       # (1, D)  f32 VPU reduce
    b2_r = b2.reshape(1).astype(jnp.float32)                # (1,)    SMEM scalar

    # Rough VMEM footprint: double-buffered x/out tiles + (worst case
    # double-buffered) resident weights. Only raise the scoped limit when
    # needed, capped with headroom for v7x's 64 MiB physical VMEM.
    bpe = jnp.dtype(compute_dtype).itemsize
    vmem_est = (2 * tm_eff * d_model * bpe                   # x tiles
                + 2 * tm_eff * jnp.dtype(out_dtype).itemsize  # out tiles
                + 2 * d_model * d_model * bpe                 # W1
                + 2 * 2 * d_model * 4)                        # b1, w2 rows
    compiler_kwargs = dict(dimension_semantics=("parallel",))
    if vmem_est > 12 * 1024 * 1024:
        compiler_kwargs["vmem_limit_bytes"] = min(int(vmem_est * 3 // 2), 48 * 1024 * 1024)

    out = pl.pallas_call(
        _mlp_kernel,
        out_shape=jax.ShapeDtypeStruct((1, n_pad), out_dtype),
        grid_spec=pltpu.PrefetchScalarGridSpec(
            num_scalar_prefetch=0,
            grid=(n_tiles,),
            in_specs=[
                pl.BlockSpec((tm_eff, d_model), lambda i: (i, 0)),     # x row tile
                pl.BlockSpec((d_model, d_model), lambda i: (0, 0)),    # W1^T (resident)
                pl.BlockSpec((1, d_model), lambda i: (0, 0)),          # b1
                pl.BlockSpec((1, d_model), lambda i: (0, 0)),          # w2 row
                pl.BlockSpec(memory_space=pltpu.MemorySpace.SMEM),     # b2 scalar
            ],
            out_specs=pl.BlockSpec((1, tm_eff), lambda i: (0, i)),     # lane-dense
        ),
        compiler_params=pltpu.CompilerParams(**compiler_kwargs),
    )(x_in, w1_t, b1_r, w2_r, b2_r)

    return out[0, :n].reshape(*lead, 1)


def _mlp_ref(features, w1, b1, w2, b2, *, bf16_matmul=False):
    """Plain-JAX reference (same math as the PyTorch module in eval mode)."""
    x, wm = features, w1
    if bf16_matmul:
        x = x.astype(jnp.bfloat16)
        wm = w1.astype(jnp.bfloat16)
    h = jnp.dot(x, wm.T, preferred_element_type=jnp.float32) + b1
    h = jnp.maximum(h, 0.0)
    return jnp.dot(h, w2.T.astype(jnp.float32),
                   preferred_element_type=jnp.float32) + b2


def _init_params(key, d_model, dtype=jnp.float32):
    """Deterministic init mimicking nn.Linear shapes: W1 (D,D), b1 (D,), W2 (1,D), b2 (1,)."""
    k1, k2, k3, k4 = jax.random.split(key, 4)
    bound = 1.0 / (d_model ** 0.5)
    w1 = jax.random.uniform(k1, (d_model, d_model), dtype, -bound, bound)
    b1 = jax.random.uniform(k2, (d_model,), dtype, -bound, bound)
    w2 = jax.random.uniform(k3, (1, d_model), dtype, -bound, bound)
    b2 = jax.random.uniform(k4, (1,), dtype, -bound, bound)
    return w1, b1, w2, b2


if __name__ == "__main__":
    D_MODEL = 32
    key = jax.random.PRNGKey(0)
    k_x1, k_x2, k_p = jax.random.split(key, 3)
    w1, b1, w2, b2 = _init_params(k_p, D_MODEL)

    # Case 1: small (N = 16) -> exercises the clamped-tile / padding path
    # (single 128-row tile instead of a 512-row one).
    feats1 = jax.random.normal(k_x1, (2, 8, D_MODEL), jnp.float32)
    out1 = jax.block_until_ready(mlp_forward(feats1, w1, b1, w2, b2))
    ref1 = _mlp_ref(feats1, w1, b1, w2, b2)
    assert out1.shape == (2, 8, 1), out1.shape
    assert jnp.allclose(out1, ref1, atol=1e-4, rtol=1e-4), \
        float(jnp.max(jnp.abs(out1 - ref1)))

    # Case 2: N = 900 -> pads to 1024, multi-tile grid (2 row tiles of 512).
    feats2 = jax.random.normal(k_x2, (3, 300, D_MODEL), jnp.float32)
    out2 = jax.block_until_ready(mlp_forward(feats2, w1, b1, w2, b2))
    ref2 = _mlp_ref(feats2, w1, b1, w2, b2)
    assert out2.shape == (3, 300, 1), out2.shape
    assert jnp.allclose(out2, ref2, atol=1e-4, rtol=1e-4), \
        float(jnp.max(jnp.abs(out2 - ref2)))

    # Case 3: bf16 fc1 operands (v6e/v7x fast path), checked against a
    # bf16-consistent reference.
    out3 = jax.block_until_ready(
        mlp_forward(feats2, w1, b1, w2, b2, use_bf16_matmul=True))
    ref3 = _mlp_ref(feats2, w1, b1, w2, b2, bf16_matmul=True)
    assert jnp.allclose(out3, ref3, atol=5e-3, rtol=5e-3), \
        float(jnp.max(jnp.abs(out3 - ref3)))

    print("KERNEL_OK")
</pallas_src>

<mosaic_0001>
module attributes {stable_mosaic.version = 11 : i64} {
  func.func @_mlp_kernel(%arg0: i32, %arg1: memref<128x32xf32, #tpu.memory_space<vmem>>, %arg2: memref<32x32xf32, #tpu.memory_space<vmem>>, %arg3: memref<1x32xf32, #tpu.memory_space<vmem>>, %arg4: memref<1x32xf32, #tpu.memory_space<vmem>>, %arg5: memref<1xf32, #tpu.memory_space<smem>>, %arg6: memref<1x128xf32, #tpu.memory_space<vmem>>) attributes {dimension_semantics = [#tpu.dimension_semantics<parallel>], iteration_bounds = array<i64: 1>, scalar_prefetch = 0 : i64, scratch_operands = 0 : i64, tpu.core_type = #tpu.core_type<tc>, window_params = [{transform_indices = @transform_0, window_bounds = array<i64: 128, 32>}, {pipeline_mode = #tpu.pipeline_mode<synchronous>, transform_indices = @transform_1, window_bounds = array<i64: 32, 32>}, {pipeline_mode = #tpu.pipeline_mode<synchronous>, transform_indices = @transform_2, window_bounds = array<i64: 1, 32>}, {pipeline_mode = #tpu.pipeline_mode<synchronous>, transform_indices = @transform_3, window_bounds = array<i64: 1, 32>}, {transform_indices = @transform_4, window_bounds = array<i64: 1>}, {transform_indices = @transform_5, window_bounds = array<i64: 1, 128>}]} {
    %c0 = arith.constant 0 : index
    %c0_0 = arith.constant 0 : index
    %0 = vector.load %arg1[%c0, %c0_0] : memref<128x32xf32, #tpu.memory_space<vmem>>, vector<128x32xf32>
    %c0_1 = arith.constant 0 : index
    %c0_2 = arith.constant 0 : index
    %1 = vector.load %arg2[%c0_1, %c0_2] : memref<32x32xf32, #tpu.memory_space<vmem>>, vector<32x32xf32>
    %cst = arith.constant dense<0.000000e+00> : vector<128x32xf32>
    %2 = tpu.matmul %0, %1, %cst {dimension_numbers = #tpu.dot_dimension_numbers<[1], [0], [0], [1], [0, 0, 1, 1], [], []>} : vector<128x32xf32>, vector<32x32xf32>, vector<128x32xf32> -> vector<128x32xf32>
    %c0_3 = arith.constant 0 : index
    %c0_4 = arith.constant 0 : index
    %3 = vector.load %arg3[%c0_3, %c0_4] : memref<1x32xf32, #tpu.memory_space<vmem>>, vector<1x32xf32>
    %4 = vector.broadcast %3 : vector<1x32xf32> to vector<128x32xf32>
    %5 = arith.addf %2, %4 : vector<128x32xf32>
    %cst_5 = arith.constant 0.000000e+00 : f32
    %6 = vector.broadcast %cst_5 : f32 to vector<128x32xf32>
    %7 = arith.maximumf %5, %6 : vector<128x32xf32>
    %c0_6 = arith.constant 0 : index
    %c0_7 = arith.constant 0 : index
    %8 = vector.load %arg4[%c0_6, %c0_7] : memref<1x32xf32, #tpu.memory_space<vmem>>, vector<1x32xf32>
    %9 = vector.broadcast %8 : vector<1x32xf32> to vector<128x32xf32>
    %10 = arith.mulf %7, %9 : vector<128x32xf32>
    %cst_8 = arith.constant dense<0.000000e+00> : vector<128xf32>
    %11 = vector.multi_reduction <add>, %10, %cst_8 [1] : vector<128x32xf32> to vector<128xf32>
    %c0_9 = arith.constant 0 : index
    %12 = memref.load %arg5[%c0_9] : memref<1xf32, #tpu.memory_space<smem>>
    %13 = vector.broadcast %12 : f32 to vector<128xf32>
    %14 = arith.addf %11, %13 : vector<128xf32>
    %15 = vector.shape_cast %14 : vector<128xf32> to vector<1x128xf32>
    %c0_10 = arith.constant 0 : index
    %c0_11 = arith.constant 0 : index
    %16 = vector.load %arg6[%c0_10, %c0_11] : memref<1x128xf32, #tpu.memory_space<vmem>>, vector<1x128xf32>
    tpu.vector_store %arg6[%c0_10, %c0_11], %15 {strides = array<i32>} : memref<1x128xf32, #tpu.memory_space<vmem>>, vector<1x128xf32>,
    return
  }
  func.func @transform_0(%arg0: i32) -> (i32, i32) {
    %c0_i32 = arith.constant 0 : i32
    %c0_i32_0 = arith.constant 0 : i32
    return %arg0, %c0_i32 : i32, i32
  }
  func.func @transform_1(%arg0: i32) -> (i32, i32) {
    %c0_i32 = arith.constant 0 : i32
    %c0_i32_0 = arith.constant 0 : i32
    %c0_i32_1 = arith.constant 0 : i32
    return %c0_i32, %c0_i32_0 : i32, i32
  }
  func.func @transform_2(%arg0: i32) -> (i32, i32) {
    %c0_i32 = arith.constant 0 : i32
    %c0_i32_0 = arith.constant 0 : i32
    %c0_i32_1 = arith.constant 0 : i32
    return %c0_i32, %c0_i32_0 : i32, i32
  }
  func.func @transform_3(%arg0: i32) -> (i32, i32) {
    %c0_i32 = arith.constant 0 : i32
    %c0_i32_0 = arith.constant 0 : i32
    %c0_i32_1 = arith.constant 0 : i32
    return %c0_i32, %c0_i32_0 : i32, i32
  }
  func.func @transform_4(%arg0: i32) -> i32 {
    %c0_i32 = arith.constant 0 : i32
    %c0_i32_0 = arith.constant 0 : i32
    return %c0_i32 : i32
  }
  func.func @transform_5(%arg0: i32) -> (i32, i32) {
    %c0_i32 = arith.constant 0 : i32
    %c0_i32_0 = arith.constant 0 : i32
    return %c0_i32, %arg0 : i32, i32
  }
}

</mosaic_0001>

<bundles_post_ra>
// kernel: squeeze.1
= control target key start
LH: loop header
LB: loop body
LE: loop exit
PB: predicated region body
PF: predicated region fallthrough
CT: control target
= control target key end

     0   :  { %s77_s0 = inlined_call_operand.vmem [shape: f32[16], index: 0, kind: input, shape index: {}]   ;;  %s78_s1 = inlined_call_operand.hbm [shape: f32[2,8,1], index: 1, kind: output, shape index: {}]  }
   0x1   :  { %v6_v0 = vld [vmem:[%s77_s0] sm:$0x1] }
   0x2   :  { %2 = vsyncpa [#allocation1], 0  ;;  %7 = vst [vmem:[#allocation3] sm:$0x1] %v6_v0  ;;  %vm9_vm0 = vcmask 64512   ;;  %s59_s0 = smov 120  }
   0x3   :  { %s60_s8 = smov [#allocation0]  }
   0x4   :  { %s29_s9 = sshll.u32 %s60_s8, 4  ;;  %s30_s9 = int_to_ptr.vmem [resolvable:$true] %s29_s9 }
   0x5   :  { %s37_s10 = scalar_lea.vmem %s30_s9, 32  ;;  %p42_p1 = scmp.lt.s32.totalorder %s30_s9, %s30_s9 }
   0x6   :  { %p38_p0 = scmp.ne.s32.totalorder %s30_s9, %s37_s10  ;;  %p43_p2 = scmp.lt.s32.totalorder %s37_s10, %s37_s10 }
   0x8   :  { %p44_p3 = por %p43_p2, %p42_p1 }
   0x9   :  { %v11_v1 = vld [vmem:[#allocation3] sm:$0x1]  }
   0xa   :  { %v8_v2 = vld [vmem:[#allocation3] sm:$0x1]   ;;  %12 = vrot.lane.b32.xlu0 %v11_v1, %s59_s0  ;;  %p45_p4 = pnand %p44_p3, %p38_p0 }
   0xb   :  { %10 = vst.msk [vmem:[#allocation2] sm:$0x1] %vm9_vm0, %v8_v2  }
  0x7c   :  { %v13_v3 = vpop.permute.xlu0 %12  }
  0x7d   :  { %16 = vst.msk [vmem:[#allocation2 + $0x1] sm:$0x1] %vm9_vm0, %v13_v3  }
  0x84   :  { %v21_v4 = vld [vmem:[#allocation2] sm:$0x3] }
  0x85   :  { %24 = vst [vmem:[#allocation0] sm:$0x3] %v21_v4 }
  0x86   :  { %48 = shalt.err (!%p45_p4)
}
  0x87   :  { %32 = dma.vmem_to_hbm [thread:$0]  %s30_s9, 32, %s78_s1, [#allocation1]  }
  0x88   :  { %57 = dma.done.wait [#allocation1], 32  }
  0x89   :  { %58 = vsyncadd [#allocation1], 4294967264 }
  0x8a   :  { %34 = vsyncpa [#allocation1], 1 }

// kernel: mlp_forward.1
= control target key start
LH: loop header
LB: loop body
LE: loop exit
PB: predicated region body
PF: predicated region fallthrough
CT: control target
= control target key end

     0   :  { %vm48_vm0 = vcmask 261120   ;;  %vm374_vm1 = vcmask 130112   ;;  %vm381_vm2 = vcmask 195712   ;;  %vm388_vm3 = vcmask 261312   ;;  %s807_s1 = inlined_call_operand.vmem [shape: f32[32,32], index: 1, kind: input, shape index: {}]   ;;  %s808_s0 = inlined_call_operand.vmem [shape: f32[128,32], index: 0, kind: input, shape index: {}]   ;;  %s809_s2 = inlined_call_operand.vmem [shape: f32[1,32], index: 2, kind: input, shape index: {}]   ;;  %s810_s3 = inlined_call_operand.vmem [shape: f32[1,32], index: 3, kind: input, shape index: {}]   ;;  %s811_s4 = inlined_call_operand.<no memory space> [shape: f32[1], index: 4, kind: input, shape index: {}]   ;;  %s812_s5 = inlined_call_operand.vmem [shape: f32[1,128], index: 5, kind: output, shape index: {}]  }
   0x1   :  { %v40_v0 = vld [vmem:[%s807_s1 + $0x18] sm:$0xff]  ;;  %v39_v1 = vld [vmem:[%s807_s1 + $0x10] sm:$0xff]  ;;  %v38_v2 = vld [vmem:[%s807_s1 + $0x8] sm:$0xff]  ;;  %vm395_vm4 = vcmask 326912   ;;  %vm402_vm5 = vcmask 392512   ;;  %vm409_vm6 = vcmask 458112  }
   0x2   :  { %518 = vmatprep.subr.mxu0 %v40_v0  ;;  %550 = vmatprep.subr.mxu1 %v40_v0  ;;  %v37_v3 = vld [vmem:[%s807_s1] sm:$0xff]  ;;  %v22_v6 = vld [vmem:[%s808_s0 + $0x8] sm:$0xff]  ;;  %v23_v8 = vld [vmem:[%s808_s0 + $0x10] sm:$0xff]  ;;  %vm416_vm7 = vcmask 523712   ;;  %vm423_vm8 = vcmask 589312   ;;  %vm430_vm9 = vcmask 654912  }
   0x3   :  { %519 = vmatpush3.msra.mxu0 %v40_v0  ;;  %554 = vmatpush3.msra.mxu1 %v40_v0  ;;  %v21_v4 = vld [vmem:[%s808_s0] sm:$0xff]  ;;  %v30_v7 = vld [vmem:[%s808_s0 + $0x48] sm:$0xff]  ;;  %v31_v9 = vld [vmem:[%s808_s0 + $0x50] sm:$0xff]  ;;  %vm437_vm10 = vcmask 720512   ;;  %vm444_vm11 = vcmask 786112   ;;  %vm451_vm12 = vcmask 851712  }
   0x4   :  { %520 = vmatprep.subr.mxu0 %v39_v1  ;;  %551 = vmatprep.subr.mxu1 %v39_v1  ;;  %v29_v5 = vld [vmem:[%s808_s0 + $0x40] sm:$0xff]  ;;  %v24_v10 = vld [vmem:[%s808_s0 + $0x18] sm:$0xff]  ;;  %v26_v14 = vld [vmem:[%s808_s0 + $0x28] sm:$0xff]  ;;  %vm458_vm13 = vcmask 917312   ;;  %vm465_vm14 = vcmask 982912   ;;  %vm472_vm15 = vcmask 1048512  }
   0x5   :  { %521 = vmatpush3.msra.mxu0 %v39_v1  ;;  %555 = vmatpush3.msra.mxu1 %v39_v1  ;;  %v32_v11 = vld [vmem:[%s808_s0 + $0x58] sm:$0xff]  ;;  %v25_v12 = vld [vmem:[%s808_s0 + $0x20] sm:$0xff]  ;;  %v34_v15 = vld [vmem:[%s808_s0 + $0x68] sm:$0xff] }
   0x6   :  { %522 = vmatprep.subr.mxu0 %v38_v2  ;;  %552 = vmatprep.subr.mxu1 %v38_v2  ;;  %v33_v13 = vld [vmem:[%s808_s0 + $0x60] sm:$0xff]  ;;  %v27_v16 = vld [vmem:[%s808_s0 + $0x30] sm:$0xff]  ;;  %v28_v18 = vld [vmem:[%s808_s0 + $0x38] sm:$0xff] }
   0x7   :  { %523 = vmatpush3.msra.mxu0 %v38_v2  ;;  %556 = vmatpush3.msra.mxu1 %v38_v2  ;;  %v35_v17 = vld [vmem:[%s808_s0 + $0x70] sm:$0xff]  ;;  %v36_v19 = vld [vmem:[%s808_s0 + $0x78] sm:$0xff]  ;;  %v667_v20 = vld [vmem:[%s809_s2] ss:$0 sm:$0xff] }
   0x8   :  { %524 = vmatprep.subr.mxu0 %v37_v3  ;;  %553 = vmatprep.subr.mxu1 %v37_v3  ;;  %v676_v31 = vld [vmem:[%s810_s3] ss:$0 sm:$0xff] }
   0x9   :  { %525 = vmatpush3.msra.mxu0 %v37_v3  ;;  %557 = vmatpush3.msra.mxu1 %v37_v3 }
   0xa   :  { %526 = vmatprep.mubr.msk.f32.mxu0 %vm48_vm0, %v21_v4  ;;  %538 = vmatprep.mubr.msk.f32.mxu1 %vm48_vm0, %v29_v5 }
   0xb   :  { %527 = vmatmul.mubr.msk.f32.vlgmr.msra.gmra.mxu0 %vm48_vm0, %v22_v6  ;;  %539 = vmatmul.mubr.msk.f32.vlgmr.msra.gmra.mxu1 %vm48_vm0, %v30_v7 }
   0xc   :  { %529 = vmatprep.mubr.msk.f32.mxu0 %vm48_vm0, %v23_v8  ;;  %541 = vmatprep.mubr.msk.f32.mxu1 %vm48_vm0, %v31_v9 }
   0xf   :  { %530 = vmatmul.mubr.msk.f32.gmra.mxu0 %vm48_vm0, %v24_v10  ;;  %542 = vmatmul.mubr.msk.f32.gmra.mxu1 %vm48_vm0, %v32_v11 }
  0x10   :  { %532 = vmatprep.mubr.msk.f32.mxu0 %vm48_vm0, %v25_v12  ;;  %544 = vmatprep.mubr.msk.f32.mxu1 %vm48_vm0, %v33_v13 }
  0x13   :  { %533 = vmatmul.mubr.msk.f32.gmra.mxu0 %vm48_vm0, %v26_v14  ;;  %545 = vmatmul.mubr.msk.f32.gmra.mxu1 %vm48_vm0, %v34_v15 }
  0x14   :  { %535 = vmatprep.mubr.msk.f32.mxu0 %vm48_vm0, %v27_v16  ;;  %547 = vmatprep.mubr.msk.f32.mxu1 %vm48_vm0, %v35_v17 }
  0x17   :  { %536 = vmatmul.mubr.msk.f32.gmra.mxu0 %vm48_vm0, %v28_v18  ;;  %548 = vmatmul.mubr.msk.f32.gmra.mxu1 %vm48_vm0, %v36_v19 }
  0xcb   :  { %v528_v21 = vpop.f32.mrf.mxu0  ;;  %v540_v22 = vpop.f32.mrf.mxu1 }
  0xcc   :  { %v169_v23 = vadd.f32 %v528_v21, %v667_v20  ;;  %v209_v24 = vadd.f32 %v540_v22, %v667_v20 }
  0xcd   :  { %v163_v25 = vpop.f32.mrf.mxu0  ;;  %v203_v26 = vpop.f32.mrf.mxu1 }
  0xce   :  { %v243_v27 = vmax.f32 %v169_v23, 0.0  ;;  %v251_v28 = vmax.f32 %v209_v24, 0.0  ;;  %v164_v29 = vadd.f32 %v667_v20, %v163_v25  ;;  %v204_v30 = vadd.f32 %v667_v20, %v203_v26 }
  0xcf   :  { %v531_v32 = vpop.f32.mrf.mxu0  ;;  %v543_v33 = vpop.f32.mrf.mxu1 }
  0xd0   :  { %v242_v34 = vmax.f32 %v164_v29, 0.0  ;;  %v179_v35 = vadd.f32 %v531_v32, %v667_v20  ;;  %v219_v36 = vadd.f32 %v543_v33, %v667_v20  ;;  %v274_v38 = vmul.f32 %v676_v31, %v251_v28 }
  0xd1   :  { %v173_v37 = vpop.f32.mrf.mxu0  ;;  %v266_v39 = vmul.f32 %v676_v31, %v243_v27  ;;  %v213_v40 = vpop.f32.mrf.mxu1  ;;  %v250_v41 = vmax.f32 %v204_v30, 0.0 }
  0xd2   :  { %v245_v42 = vmax.f32 %v179_v35, 0.0  ;;  %v174_v43 = vadd.f32 %v667_v20, %v173_v37  ;;  %v253_v44 = vmax.f32 %v219_v36, 0.0  ;;  %v308_v45 = vsel %vm48_vm0, %v274_v38, 0.0 }
  0xd3   :  { %v284_v46 = vsel %vm48_vm0, %v266_v39, 0.0  ;;  %v214_v47 = vadd.f32 %v667_v20, %v213_v40  ;;  %v534_v48 = vpop.f32.mrf.mxu0  ;;  %v265_v49 = vmul.f32 %v676_v31, %v242_v34  ;;  %309 = vadd.xlane.f32.xlu1 %v308_v45  ;;  %v546_v51 = vpop.f32.mrf.mxu1  ;;  %v273_v57 = vmul.f32 %v676_v31, %v250_v41 }
  0xd4   :  { %285 = vadd.xlane.f32.xlu0 %v284_v46  ;;  %v268_v50 = vmul.f32 %v676_v31, %v245_v42  ;;  %v276_v53 = vmul.f32 %v676_v31, %v253_v44  ;;  %v244_v54 = vmax.f32 %v174_v43, 0.0  ;;  %v189_v56 = vadd.f32 %v534_v48, %v667_v20 }
  0xd5   :  { %v183_v52 = vpop.f32.mrf.mxu0  ;;  %v252_v58 = vmax.f32 %v214_v47, 0.0  ;;  %v281_v59 = vsel %vm48_vm0, %v265_v49, 0.0  ;;  %v223_v62 = vpop.f32.mrf.mxu1  ;;  %v305_v2 = vsel %vm48_vm0, %v273_v57, 0.0  ;;  %v229_v9 = vadd.f32 %v546_v51, %v667_v20 }
  0xd6   :  { %v290_v55 = vsel %vm48_vm0, %v268_v50, 0.0  ;;  %v184_v60 = vadd.f32 %v667_v20, %v183_v52  ;;  %v314_v63 = vsel %vm48_vm0, %v276_v53, 0.0  ;;  %v247_v1 = vmax.f32 %v189_v56, 0.0 }
  0xd7   :  { %v537_v61 = vpop.f32.mrf.mxu0  ;;  %291 = vadd.xlane.f32.xlu1 %v290_v55  ;;  %v267_v3 = vmul.f32 %v676_v31, %v244_v54  ;;  %v275_v7 = vmul.f32 %v676_v31, %v252_v58  ;;  %v549_v8 = vpop.f32.mrf.mxu1  ;;  %v224_v11 = vadd.f32 %v667_v20, %v223_v62  ;;  %v255_v18 = vmax.f32 %v229_v9, 0.0 }
  0xd8   :  { %282 = vadd.xlane.f32.xlu0 %v281_v59  ;;  %v246_v4 = vmax.f32 %v184_v60, 0.0  ;;  %v199_v5 = vadd.f32 %v537_v61, %v667_v20  ;;  %v270_v12 = vmul.f32 %v676_v31, %v247_v1  ;;  %v239_v21 = vadd.f32 %v549_v8, %v667_v20 }
  0xd9   :  { %v193_v0 = vpop.f32.mrf.mxu0  ;;  %v287_v10 = vsel %vm48_vm0, %v267_v3, 0.0  ;;  %v311_v15 = vsel %vm48_vm0, %v275_v7, 0.0  ;;  %v233_v17 = vpop.f32.mrf.mxu1  ;;  %v254_v19 = vmax.f32 %v224_v11, 0.0  ;;  %v278_v28 = vmul.f32 %v676_v31, %v255_v18 }
  0xda   :  { %v194_v6 = vadd.f32 %v667_v20, %v193_v0  ;;  %v249_v13 = vmax.f32 %v199_v5, 0.0  ;;  %v269_v16 = vmul.f32 %v676_v31, %v246_v4  ;;  %v296_v22 = vsel %vm48_vm0, %v270_v12, 0.0 }
  0xdb   :  { %315 = vadd.xlane.f32.xlu1 %v314_v63  ;;  %v234_v24 = vadd.f32 %v667_v20, %v233_v17  ;;  %v257_v27 = vmax.f32 %v239_v21, 0.0  ;;  %v277_v33 = vmul.f32 %v676_v31, %v254_v19  ;;  %v320_v20 = vsel %vm48_vm0, %v278_v28, 0.0 }
  0xdc   :  { %306 = vadd.xlane.f32.xlu0 %v305_v2  ;;  %v248_v14 = vmax.f32 %v194_v6, 0.0  ;;  %v293_v23 = vsel %vm48_vm0, %v269_v16, 0.0  ;;  %v272_v25 = vmul.f32 %v676_v31, %v249_v13  ;;  %v363_v39 = vlaneseq }
  0xdd   :  { %v256_v29 = vmax.f32 %v234_v24, 0.0  ;;  %v317_v34 = vsel %vm48_vm0, %v277_v33, 0.0  ;;  %v280_v35 = vmul.f32 %v676_v31, %v257_v27  ;;  %v732_v46 = vstv %s811_s4 }
  0xde   :  { %v271_v26 = vmul.f32 %v676_v31, %v248_v14  ;;  %v302_v30 = vsel %vm48_vm0, %v272_v25, 0.0  ;;  %v724_v42 = vand.u32 127, %v363_v39  ;;  %v726_v45 = vshrl.u32 %v363_v39, 7 }
  0xdf   :  { %288 = vadd.xlane.f32.xlu1 %v287_v10  ;;  %v279_v36 = vmul.f32 %v676_v31, %v256_v29  ;;  %v326_v37 = vsel %vm48_vm0, %v280_v35, 0.0 }
  0xe0   :  { %312 = vadd.xlane.f32.xlu0 %v311_v15  ;;  %v299_v32 = vsel %vm48_vm0, %v271_v26, 0.0  ;;  %v369_v31 = vadd.s32 4294967288, %v724_v42  ;;  %v376_v47 = vadd.s32 4294967280, %v724_v42  ;;  %v367_v48 = vsub.s32 %v724_v42, %v726_v45 }
  0xe1   :  { %v323_v38 = vsel %vm48_vm0, %v279_v36, 0.0  ;;  %v741_v52 = vadd.s32 4294967224, %v724_v42  ;;  %v383_v53 = vadd.s32 4294967272, %v724_v42  ;;  %v747_v56 = vadd.s32 4294967232, %v724_v42 }
  0xe2   :  { %v372_v54 = vsub.s32 %v369_v31, %v726_v45  ;;  %v379_v57 = vsub.s32 %v376_v47, %v726_v45  ;;  %v390_v58 = vadd.s32 4294967264, %v724_v42  ;;  %v752_v60 = vadd.s32 4294967208, %v724_v42 }
  0xe3   :  { %297 = vadd.xlane.f32.xlu1 %v296_v22  ;;  %v755_v62 = vadd.s32 4294967216, %v724_v42  ;;  %v397_v0 = vadd.s32 4294967256, %v724_v42  ;;  %v428_v1 = vsub.s32 %v741_v52, %v726_v45  ;;  %v386_v2 = vsub.s32 %v383_v53, %v726_v45 }
  0xe4   :  { %294 = vadd.xlane.f32.xlu0 %v293_v23  ;;  %v411_v6 = vadd.s32 4294967240, %v724_v42  ;;  %v421_v7 = vsub.s32 %v747_v56, %v726_v45  ;;  %v393_v9 = vsub.s32 %v390_v58, %v726_v45  ;;  %v404_v10 = vadd.s32 4294967248, %v724_v42 }
  0xe5   :  { %v442_v12 = vsub.s32 %v752_v60, %v726_v45  ;;  %v435_v13 = vsub.s32 %v755_v62, %v726_v45  ;;  %v400_v14 = vsub.s32 %v397_v0, %v726_v45  ;;  %v453_v23 = vadd.s32 4294967192, %v724_v42 }
  0xe6   :  { %v414_v22 = vsub.s32 %v411_v6, %v726_v45  ;;  %v407_v25 = vsub.s32 %v404_v10, %v726_v45 }
  0xe7   :  { %303 = vadd.xlane.f32.xlu1 %v302_v30  ;;  %v446_v30 = vadd.s32 4294967200, %v724_v42  ;;  %v456_v36 = vsub.s32 %v453_v23, %v726_v45 }
  0xe8   :  { %300 = vadd.xlane.f32.xlu0 %v299_v32 }
  0xeb   :  { %321 = vadd.xlane.f32.xlu1 %v320_v20 }
  0xec   :  { %318 = vadd.xlane.f32.xlu0 %v317_v34 }
  0xef   :  { %327 = vadd.xlane.f32.xlu1 %v326_v37  ;;  %v467_v37 = vadd.s32 4294967176, %v724_v42 }
  0xf0   :  { %324 = vadd.xlane.f32.xlu0 %v323_v38 }
  0xf1   :  { %v470_v56 = vsub.s32 %v467_v37, %v726_v45 }
 0x15c   :  { %v722_v40 = vpop.xlane.xlu1 %309 }
 0x15d   :  { %v286_v41 = vpop.xlane.xlu0 %285  ;;  %v340_v35 = vadd.f32 %v732_v46, %v722_v40  ;;  %v449_v40 = vsub.s32 %v446_v30, %v726_v45 }
 0x15e   :  { %v332_v55 = vadd.f32 %v732_v46, %v286_v41 }
 0x15f   :  { %v429_v53 = vrot.slane %v340_v35, %v428_v1 }
 0x160   :  { %v292_v43 = vpop.xlane.xlu1 %291  ;;  %v373_v4 = vrot.slane %v332_v55, %v372_v54 }
 0x161   :  { %v283_v44 = vpop.xlane.xlu0 %282  ;;  %v334_v5 = vadd.f32 %v732_v46, %v292_v43  ;;  %v460_v43 = vadd.s32 4294967184, %v724_v42 }
 0x162   :  { %v331_v49 = vadd.f32 %v732_v46, %v283_v44 }
 0x163   :  { %v387_v21 = vrot.slane %v334_v5, %v386_v2 }
 0x164   :  { %v738_v50 = vpop.xlane.xlu1 %315  ;;  %v368_v59 = vrot.slane %v331_v49, %v367_v48 }
 0x165   :  { %v307_v51 = vpop.xlane.xlu0 %306  ;;  %v342_v44 = vadd.f32 %v732_v46, %v738_v50 }
 0x166   :  { %v375_v11 = vsel %vm374_vm1, %v373_v4, %v368_v59  ;;  %v339_v32 = vadd.f32 %v732_v46, %v307_v51 }
 0x167   :  { %v443_v58 = vrot.slane %v342_v44, %v442_v12 }
 0x168   :  { %v289_v61 = vpop.xlane.xlu1 %288  ;;  %v422_v49 = vrot.slane %v339_v32, %v421_v7 }
 0x169   :  { %v313_v63 = vpop.xlane.xlu0 %312  ;;  %v333_v3 = vadd.f32 %v732_v46, %v289_v61 }
 0x16a   :  { %v341_v38 = vadd.f32 %v732_v46, %v313_v63 }
 0x16b   :  { %v380_v8 = vrot.slane %v333_v3, %v379_v57  ;;  %v463_v57 = vsub.s32 %v460_v43, %v726_v45 }
 0x16c   :  { %v298_v15 = vpop.xlane.xlu1 %297  ;;  %v436_v50 = vrot.slane %v341_v38, %v435_v13 }
 0x16d   :  { %v295_v16 = vpop.xlane.xlu0 %294  ;;  %v382_v17 = vsel %vm381_vm2, %v380_v8, %v375_v11  ;;  %v336_v18 = vadd.f32 %v732_v46, %v298_v15 }
 0x16e   :  { %v335_v19 = vadd.f32 %v732_v46, %v295_v16  ;;  %v389_v27 = vsel %vm388_vm3, %v387_v21, %v382_v17 }
 0x16f   :  { %v401_v26 = vrot.slane %v336_v18, %v400_v14 }
 0x170   :  { %v394_v24 = vrot.slane %v335_v19, %v393_v9  ;;  %v304_v28 = vpop.xlane.xlu1 %303 }
 0x171   :  { %v301_v29 = vpop.xlane.xlu0 %300  ;;  %v338_v20 = vadd.f32 %v732_v46, %v304_v28 }
 0x172   :  { %v396_v33 = vsel %vm395_vm4, %v394_v24, %v389_v27  ;;  %v337_v34 = vadd.f32 %v732_v46, %v301_v29 }
 0x173   :  { %v415_v39 = vrot.slane %v338_v20, %v414_v22  ;;  %v403_v31 = vsel %vm402_vm5, %v401_v26, %v396_v33 }
 0x174   :  { %v408_v41 = vrot.slane %v337_v34, %v407_v25  ;;  %v322_v47 = vpop.xlane.xlu1 %321 }
 0x175   :  { %v319_v48 = vpop.xlane.xlu0 %318  ;;  %v344_v42 = vadd.f32 %v732_v46, %v322_v47 }
 0x176   :  { %v410_v51 = vsel %vm409_vm6, %v408_v41, %v403_v31  ;;  %v343_v52 = vadd.f32 %v732_v46, %v319_v48 }
 0x177   :  { %v417_v54 = vsel %vm416_vm7, %v415_v39, %v410_v51  ;;  %v457_v2 = vrot.slane %v344_v42, %v456_v36 }
 0x178   :  { %v424_v55 = vsel %vm423_vm8, %v422_v49, %v417_v54  ;;  %v328_v60 = vpop.xlane.xlu1 %327  ;;  %v450_v63 = vrot.slane %v343_v52, %v449_v40 }
 0x179   :  { %v431_v59 = vsel %vm430_vm9, %v429_v53, %v424_v55  ;;  %v325_v61 = vpop.xlane.xlu0 %324  ;;  %v346_v0 = vadd.f32 %v732_v46, %v328_v60 }
 0x17a   :  { %v438_v62 = vsel %vm437_vm10, %v436_v50, %v431_v59  ;;  %v345_v1 = vadd.f32 %v732_v46, %v325_v61 }
 0x17b   :  { %v445_v3 = vsel %vm444_vm11, %v443_v58, %v438_v62  ;;  %v471_v45 = vrot.slane %v346_v0, %v470_v56 }
 0x17c   :  { %v452_v4 = vsel %vm451_vm12, %v450_v63, %v445_v3  ;;  %v464_v5 = vrot.slane %v345_v1, %v463_v57 }
 0x17d   :  { %v459_v6 = vsel %vm458_vm13, %v457_v2, %v452_v4 }
 0x17e   :  { %v466_v7 = vsel %vm465_vm14, %v464_v5, %v459_v6 }
 0x17f   :  { %v473_v8 = vsel %vm472_vm15, %v471_v45, %v466_v7 }
 0x180   :  { %475 = vst [vmem:[%s812_s5] sm:$0x1] %v473_v8 }

</bundles_post_ra>
